<compile_context>
chip_gen: v5e
topology: v5e:2x2
jax: 0.10.0
libtpu: 0.0.40
codegen_flags: <defaults>
</compile_context>

<pallas_src>
import numpy as np
import jax
import jax.numpy as jnp
from jax.experimental import pallas as pl
from jax.experimental.pallas import tpu as pltpu


def _adaptive_avgpool_kernel(w_ref, x_ref, o_ref):
    """One grid step handles one batch element.

    w_ref: (n, H) f32 pooling weights (1/((end-start)*W) folded in, zeros elsewhere)
    x_ref: (1, H, W, C) VMEM tile (full spatial extent of batch b)
    o_ref: (1, n, C)    VMEM tile (all n bins for batch b, single store)
    """
    # Reduce over W once, accumulating in float32 (VPU lanes are 32-bit anyway;
    # mandatory on v5e which has no bf16 VPU path).
    xw = jnp.sum(x_ref[0].astype(jnp.float32), axis=1)            # (H, C) f32

    # All n adaptive bins in one small matmul on the MXU; the 1/count scale is
    # already folded into the weights, so no divide is needed in the kernel.
    pooled = jnp.dot(w_ref[...], xw,
                     preferred_element_type=jnp.float32)          # (n, C) f32

    # One store for the whole per-batch slab (n on sublane, C on lane).
    o_ref[0] = pooled.astype(o_ref.dtype)


def _pooling_weights(H, W, n):
    """(n, H) f32 matrix M s.t. M @ sum_over_W(x) == AdaptiveAvgPool2d((n,1)) bins."""
    w = np.zeros((n, H), dtype=np.float32)
    for i in range(n):
        start = (i * H) // n
        end = -(-((i + 1) * H) // n)      # ceil((i+1)*H/n)
        w[i, start:end] = 1.0 / ((end - start) * W)
    return jnp.asarray(w)


def patch_merging_avepooling(x, n):
    """x: (B, H, W, C) float array -> (B, n, 1, C)  (== PyTorch module forward)."""
    B, H, W, C = x.shape
    weights = _pooling_weights(H, W, n)

    # TODO(synk): for very large feature maps where the full (1, H, W, C) block
    # (double-buffered) exceeds v7x's 64 MiB VMEM, add an "arbitrary" W/H tiling
    # grid axis with an f32 scratch accumulator and set vmem_limit_bytes.
    out = pl.pallas_call(
        _adaptive_avgpool_kernel,
        out_shape=jax.ShapeDtypeStruct((B, n, C), x.dtype),
        grid_spec=pltpu.PrefetchScalarGridSpec(
            num_scalar_prefetch=0,
            grid=(B,),
            in_specs=[
                # tiny pooling matrix; constant block index -> stays resident
                pl.BlockSpec((n, H), lambda b: (0, 0)),
                # full spatial tile for batch b (last two dims == full array dims)
                pl.BlockSpec((1, H, W, C), lambda b: (b, 0, 0, 0)),
            ],
            # one slab per batch: all n bins written in a single store
            out_specs=pl.BlockSpec((1, n, C), lambda b: (b, 0, 0)),
        ),
        compiler_params=pltpu.CompilerParams(
            # batch axis parallel -> shards across v7x's two TensorCores
            dimension_semantics=("parallel",),
        ),
    )(weights, x)

    # Free metadata reshape back to the PyTorch output layout (B, n, 1, C).
    return out.reshape(B, n, 1, C)


def _reference(x_np, n):
    """NumPy reference of PyTorch AdaptiveAvgPool2d((n,1)) + permutes."""
    B, H, W, C = x_np.shape
    out = np.zeros((B, n, 1, C), dtype=np.float32)
    for i in range(n):
        start = (i * H) // n
        end = -(-((i + 1) * H) // n)  # ceil
        out[:, i, 0, :] = x_np[:, start:end, :, :].astype(np.float32).mean(axis=(1, 2))
    return out.astype(x_np.dtype)


if __name__ == "__main__":
    key = jax.random.PRNGKey(0)
    B, H, W, C = 2, 16, 16, 4
    n = 5  # deliberately does not divide H -> exercises adaptive windows

    x = jax.random.normal(key, (B, H, W, C), dtype=jnp.float32)

    out = patch_merging_avepooling(x, n)
    out = jax.block_until_ready(out)

    ref = _reference(np.asarray(x), n)
    assert out.shape == (B, n, 1, C), out.shape
    np.testing.assert_allclose(np.asarray(out), ref, rtol=1e-5, atol=1e-5)

    print("KERNEL_OK")
</pallas_src>

<mosaic_0001>
module attributes {stable_mosaic.version = 11 : i64} {
  func.func @_adaptive_avgpool_kernel(%arg0: i32, %arg1: memref<5x16xf32, #tpu.memory_space<vmem>>, %arg2: memref<1x16x16x4xf32, #tpu.memory_space<vmem>>, %arg3: memref<1x5x4xf32, #tpu.memory_space<vmem>>) attributes {dimension_semantics = [#tpu.dimension_semantics<parallel>], iteration_bounds = array<i64: 2>, scalar_prefetch = 0 : i64, scratch_operands = 0 : i64, tpu.core_type = #tpu.core_type<tc>, window_params = [{pipeline_mode = #tpu.pipeline_mode<synchronous>, transform_indices = @transform_0, window_bounds = array<i64: 5, 16>}, {transform_indices = @transform_1, window_bounds = array<i64: 1, 16, 16, 4>}, {transform_indices = @transform_2, window_bounds = array<i64: 1, 5, 4>}]} {
    %c0 = arith.constant 0 : index
    %c0_0 = arith.constant 0 : index
    %c0_1 = arith.constant 0 : index
    %c0_2 = arith.constant 0 : index
    %0 = vector.load %arg2[%c0, %c0_0, %c0_1, %c0_2] : memref<1x16x16x4xf32, #tpu.memory_space<vmem>>, vector<1x16x16x4xf32>
    %1 = vector.shape_cast %0 : vector<1x16x16x4xf32> to vector<16x16x4xf32>
    %cst = arith.constant dense<0.000000e+00> : vector<16x4xf32>
    %2 = vector.multi_reduction <add>, %1, %cst [1] : vector<16x16x4xf32> to vector<16x4xf32>
    %c0_3 = arith.constant 0 : index
    %c0_4 = arith.constant 0 : index
    %3 = vector.load %arg1[%c0_3, %c0_4] : memref<5x16xf32, #tpu.memory_space<vmem>>, vector<5x16xf32>
    %cst_5 = arith.constant dense<0.000000e+00> : vector<5x4xf32>
    %4 = tpu.matmul %3, %2, %cst_5 {dimension_numbers = #tpu.dot_dimension_numbers<[1], [0], [0], [1], [0, 0, 1, 1], [], []>} : vector<5x16xf32>, vector<16x4xf32>, vector<5x4xf32> -> vector<5x4xf32>
    %c0_6 = arith.constant 0 : index
    %c0_7 = arith.constant 0 : index
    %c0_8 = arith.constant 0 : index
    %5 = vector.load %arg3[%c0_6, %c0_7, %c0_8] : memref<1x5x4xf32, #tpu.memory_space<vmem>>, vector<1x5x4xf32>
    %6 = vector.shape_cast %5 : vector<1x5x4xf32> to vector<5x4xf32>
    %7 = vector.shape_cast %4 : vector<5x4xf32> to vector<1x5x4xf32>
    tpu.vector_store %arg3[%c0_6, %c0_7, %c0_8], %7 {strides = array<i32>} : memref<1x5x4xf32, #tpu.memory_space<vmem>>, vector<1x5x4xf32>,
    return
  }
  func.func @transform_0(%arg0: i32) -> (i32, i32) {
    %c0_i32 = arith.constant 0 : i32
    %c0_i32_0 = arith.constant 0 : i32
    %c0_i32_1 = arith.constant 0 : i32
    return %c0_i32, %c0_i32_0 : i32, i32
  }
  func.func @transform_1(%arg0: i32) -> (i32, i32, i32, i32) {
    %c0_i32 = arith.constant 0 : i32
    %c0_i32_0 = arith.constant 0 : i32
    %c0_i32_1 = arith.constant 0 : i32
    %c0_i32_2 = arith.constant 0 : i32
    return %arg0, %c0_i32, %c0_i32_0, %c0_i32_1 : i32, i32, i32, i32
  }
  func.func @transform_2(%arg0: i32) -> (i32, i32, i32) {
    %c0_i32 = arith.constant 0 : i32
    %c0_i32_0 = arith.constant 0 : i32
    %c0_i32_1 = arith.constant 0 : i32
    return %arg0, %c0_i32, %c0_i32_0 : i32, i32, i32
  }
}

</mosaic_0001>

<bundles_post_ra>
// kernel: tpu_custom_call.1
= control target key start
LH: loop header
LB: loop body
LE: loop exit
PB: predicated region body
PF: predicated region fallthrough
CT: control target
= control target key end

     0   :  { %s481_s9 = smov 0   ;;  %s585_s0 = inlined_call_operand.vmem [shape: f32[5,16], index: 0, kind: input, shape index: {}]   ;;  %s586_s1 = inlined_call_operand.vmem [shape: f32[2,16,16,4], index: 1, kind: input, shape index: {}]   ;;  %s587_s2 = inlined_call_operand.vmem [shape: f32[2,5,4], index: 2, kind: output, shape index: {}]  }
   0x1 LB: > { %s438_s10 = sadd.s32 4294967295, %s464_s9   ;;  %p442_p0 = scmp.ge.s32.totalorder %s464_s9, 1  ;;  %s464_s9 = sphi %s481_s9, %s12_s9  }
   0x2   : > { %p112_p1 = scmp.lt.s32.totalorder %s464_s9, 3 }
   0x4   : > { %p113_p2 = pnand %p442_p0, %p112_p1 }
   0x5   : > { %p133_p3 = scmp.lt.s32.totalorder (!%p113_p2), %s438_s10, 1 }
   0x6   : > { %116 = sbr.rel (%p113_p2) target bundleno = 189 (0xbd), region = 28 }
   0xb   : > { %s589_s10 = smov (!%p133_p3, %s438_s10), 1  ;;  %vm174_vm0 = vcmask 31744   ;;  %vm336_vm1 = vcmask 1041409   ;;  %vm338_vm2 = vcmask 1042434   ;;  %vm340_vm3 = vcmask 1043459  }
   0xc   : > { %s449_s11 = sshll.u32 %s589_s10, 8  ;;  %vm342_vm4 = vcmask 1044484   ;;  %vm344_vm5 = vcmask 1045509   ;;  %vm346_vm6 = vcmask 1046534   ;;  %vm348_vm7 = vcmask 1047559   ;;  %s445_s17 = sshll.u32 %s589_s10, 3 }
   0xd   : > { %s495_s14 = scalar_lea.vmem %s586_s1, %s449_s11  ;;  %vm359_vm8 = vcmask 130048   ;;  %s141_s20 = scalar_lea.vmem %s587_s2, %s445_s17  ;;  %vm383_vm9 = vcmask 28672  }
   0xe   : > { %v158_v0 = vld [vmem:[%s495_s14 + $0x80] sm:$0xff]  ;;  %v159_v1 = vld [vmem:[%s495_s14 + $0x88] sm:$0xff]  ;;  %v160_v2 = vld [vmem:[%s495_s14 + $0x90] sm:$0xff] }
   0xf   : > { %v161_v3 = vld [vmem:[%s495_s14 + $0x98] sm:$0xff]  ;;  %v162_v4 = vld [vmem:[%s495_s14 + $0xa0] sm:$0xff]  ;;  %v163_v5 = vld [vmem:[%s495_s14 + $0xa8] sm:$0xff]  ;;  %v247_v6 = vsel %vm174_vm0, %v158_v0, 0.0  ;;  %v248_v7 = vsel %vm174_vm0, %v159_v1, 0.0  ;;  %v256_v8 = vsel %vm174_vm0, %v160_v2, 0.0 }
  0x10   : > { %v164_v9 = vld [vmem:[%s495_s14 + $0xb0] sm:$0xff]  ;;  %v165_v10 = vld [vmem:[%s495_s14 + $0xb8] sm:$0xff]  ;;  %v166_v11 = vld [vmem:[%s495_s14 + $0xc0] sm:$0xff]  ;;  %v249_v12 = vadd.f32 %v248_v7, %v247_v6  ;;  %v257_v13 = vsel %vm174_vm0, %v161_v3, 0.0  ;;  %v265_v14 = vsel %vm174_vm0, %v162_v4, 0.0  ;;  %v266_v15 = vsel %vm174_vm0, %v163_v5, 0.0 }
  0x11   : > { %v167_v16 = vld [vmem:[%s495_s14 + $0xc8] sm:$0xff]  ;;  %v168_v17 = vld [vmem:[%s495_s14 + $0xd0] sm:$0xff]  ;;  %v169_v18 = vld [vmem:[%s495_s14 + $0xd8] sm:$0xff]  ;;  %v258_v19 = vadd.f32 %v257_v13, %v256_v8  ;;  %v267_v20 = vadd.f32 %v266_v15, %v265_v14  ;;  %v274_v21 = vsel %vm174_vm0, %v164_v9, 0.0  ;;  %v275_v22 = vsel %vm174_vm0, %v165_v10, 0.0 }
  0x12   : > { %v170_v23 = vld [vmem:[%s495_s14 + $0xe0] sm:$0xff]  ;;  %v250_v24 = vrot.slane %v249_v12, 4  ;;  %v276_v25 = vadd.f32 %v275_v22, %v274_v21  ;;  %v283_v26 = vsel %vm174_vm0, %v166_v11, 0.0  ;;  %v284_v27 = vsel %vm174_vm0, %v167_v16, 0.0  ;;  %v171_v28 = vld [vmem:[%s495_s14 + $0xe8] sm:$0xff]  ;;  %v172_v29 = vld [vmem:[%s495_s14 + $0xf0] sm:$0xff] }
  0x13   : > { %v259_v30 = vrot.slane %v258_v19, 4  ;;  %v268_v31 = vrot.slane %v267_v20, 4  ;;  %v285_v32 = vadd.f32 %v284_v27, %v283_v26  ;;  %v292_v33 = vsel %vm174_vm0, %v168_v17, 0.0  ;;  %v173_v38 = vld [vmem:[%s495_s14 + $0xf8] sm:$0xff]  ;;  %v142_v3 = vld [vmem:[%s495_s14] sm:$0xff]  ;;  %v143_v8 = vld [vmem:[%s495_s14 + $0x8] sm:$0xff] }
  0x14   : > { %v251_v34 = vadd.f32 %v250_v24, %v249_v12  ;;  %v277_v35 = vrot.slane %v276_v25, 4  ;;  %v293_v36 = vsel %vm174_vm0, %v169_v18, 0.0  ;;  %v301_v37 = vsel %vm174_vm0, %v170_v23, 0.0  ;;  %v144_v16 = vld [vmem:[%s495_s14 + $0x10] sm:$0xff]  ;;  %v145_v17 = vld [vmem:[%s495_s14 + $0x18] sm:$0xff]  ;;  %v146_v26 = vld [vmem:[%s495_s14 + $0x20] sm:$0xff] }
  0x15   : > { %v260_v39 = vadd.f32 %v259_v30, %v258_v19  ;;  %v269_v40 = vadd.f32 %v268_v31, %v267_v20  ;;  %v286_v41 = vrot.slane %v285_v32, 4  ;;  %v294_v42 = vadd.f32 %v293_v36, %v292_v33  ;;  %v147_v27 = vld [vmem:[%s495_s14 + $0x28] sm:$0xff]  ;;  %v148_v36 = vld [vmem:[%s495_s14 + $0x30] sm:$0xff] }
  0x16   : > { %v252_v43 = vrot.slane %v251_v34, 2  ;;  %v278_v44 = vadd.f32 %v277_v35, %v276_v25  ;;  %v302_v45 = vsel %vm174_vm0, %v171_v28, 0.0  ;;  %v310_v46 = vsel %vm174_vm0, %v172_v29, 0.0 }
  0x17   : > { %v261_v47 = vrot.slane %v260_v39, 2  ;;  %v270_v48 = vrot.slane %v269_v40, 2  ;;  %v287_v49 = vadd.f32 %v286_v41, %v285_v32  ;;  %v295_v50 = vrot.slane %v294_v42, 4 }
  0x18   : > { %v253_v51 = vadd.f32 %v252_v43, %v251_v34  ;;  %v279_v52 = vrot.slane %v278_v44, 2  ;;  %v303_v53 = vadd.f32 %v302_v45, %v301_v37  ;;  %v311_v54 = vsel %vm174_vm0, %v173_v38, 0.0  ;;  %v149_v37 = vld [vmem:[%s495_s14 + $0x38] sm:$0xff]  ;;  %v150_v38 = vld [vmem:[%s495_s14 + $0x40] sm:$0xff] }
  0x19   : > { %v262_v55 = vadd.f32 %v261_v47, %v260_v39  ;;  %v271_v56 = vadd.f32 %v270_v48, %v269_v40  ;;  %v288_v57 = vrot.slane %v287_v49, 2  ;;  %v296_v58 = vadd.f32 %v295_v50, %v294_v42  ;;  %v152_v47 = vld [vmem:[%s495_s14 + $0x50] sm:$0xff] }
  0x1a   : > { %v254_v59 = vrot.slane %v253_v51, 1  ;;  %v280_v60 = vadd.f32 %v279_v52, %v278_v44  ;;  %v304_v61 = vrot.slane %v303_v53, 4  ;;  %v312_v62 = vadd.f32 %v311_v54, %v310_v46  ;;  %v151_v46 = vld [vmem:[%s495_s14 + $0x48] sm:$0xff] }
  0x1b   : > { %v263_v63 = vrot.slane %v262_v55, 1  ;;  %v272_v0 = vrot.slane %v271_v56, 1  ;;  %v289_v1 = vadd.f32 %v288_v57, %v287_v49  ;;  %v297_v2 = vrot.slane %v296_v58, 2  ;;  %v154_v57 = vld [vmem:[%s495_s14 + $0x60] sm:$0xff] }
  0x1c   : > { %v255_v4 = vadd.f32 %v254_v59, %v253_v51  ;;  %v281_v5 = vrot.slane %v280_v60, 1  ;;  %v305_v6 = vadd.f32 %v304_v61, %v303_v53  ;;  %v313_v7 = vrot.slane %v312_v62, 4 }
  0x1d   : > { %v264_v9 = vadd.f32 %v263_v63, %v262_v55  ;;  %v273_v10 = vadd.f32 %v272_v0, %v271_v56  ;;  %v290_v11 = vrot.slane %v289_v1, 1  ;;  %v298_v12 = vadd.f32 %v297_v2, %v296_v58  ;;  %v153_v56 = vld [vmem:[%s495_s14 + $0x58] sm:$0xff]  ;;  %v156_v2 = vld [vmem:[%s495_s14 + $0x70] sm:$0xff] }
  0x1e   : > { %v282_v13 = vadd.f32 %v281_v5, %v280_v60  ;;  %v306_v14 = vrot.slane %v305_v6, 2  ;;  %v314_v15 = vadd.f32 %v313_v7, %v312_v62  ;;  %v175_v18 = vsel %vm174_vm0, %v142_v3, 0.0 }
  0x1f   : > { %v291_v19 = vadd.f32 %v290_v11, %v289_v1  ;;  %v299_v20 = vrot.slane %v298_v12, 1  ;;  %v350_v21 = vsel %vm336_vm1, %v264_v9, %v255_v4  ;;  %v176_v22 = vsel %vm174_vm0, %v143_v8, 0.0  ;;  %v155_v1 = vld [vmem:[%s495_s14 + $0x68] sm:$0xff] }
  0x20   : > { %v307_v23 = vadd.f32 %v306_v14, %v305_v6  ;;  %v315_v24 = vrot.slane %v314_v15, 2  ;;  %v351_v25 = vsel %vm338_vm2, %v273_v10, %v350_v21  ;;  %v177_v28 = vadd.f32 %v176_v22, %v175_v18  ;;  %v157_v10 = vld [vmem:[%s495_s14 + $0x78] sm:$0xff] }
  0x21   : > { %v300_v29 = vadd.f32 %v299_v20, %v298_v12  ;;  %v352_v30 = vsel %vm340_vm3, %v282_v13, %v351_v25  ;;  %v184_v31 = vsel %vm174_vm0, %v144_v16, 0.0  ;;  %v185_v32 = vsel %vm174_vm0, %v145_v17, 0.0 }
  0x22   : > { %v308_v33 = vrot.slane %v307_v23, 1  ;;  %v316_v34 = vadd.f32 %v315_v24, %v314_v15  ;;  %v353_v35 = vsel %vm342_vm4, %v291_v19, %v352_v30  ;;  %v178_v39 = vrot.slane %v177_v28, 4 }
  0x23   : > { %v354_v40 = vsel %vm344_vm5, %v300_v29, %v353_v35  ;;  %v186_v41 = vadd.f32 %v185_v32, %v184_v31  ;;  %v193_v42 = vsel %vm174_vm0, %v146_v26, 0.0  ;;  %v194_v43 = vsel %vm174_vm0, %v147_v27, 0.0 }
  0x24   : > { %v309_v44 = vadd.f32 %v308_v33, %v307_v23  ;;  %v317_v45 = vrot.slane %v316_v34, 1  ;;  %v179_v48 = vadd.f32 %v178_v39, %v177_v28  ;;  %v195_v49 = vadd.f32 %v194_v43, %v193_v42 }
  0x25   : > { %v187_v50 = vrot.slane %v186_v41, 4  ;;  %v202_v51 = vsel %vm174_vm0, %v148_v36, 0.0  ;;  %v203_v52 = vsel %vm174_vm0, %v149_v37, 0.0  ;;  %v211_v53 = vsel %vm174_vm0, %v150_v38, 0.0 }
  0x26   : > { %v318_v54 = vadd.f32 %v317_v45, %v316_v34  ;;  %v355_v55 = vsel %vm346_vm6, %v309_v44, %v354_v40  ;;  %v180_v58 = vrot.slane %v179_v48, 2  ;;  %v196_v59 = vrot.slane %v195_v49, 4 }
  0x27   : > { %v188_v60 = vadd.f32 %v187_v50, %v186_v41  ;;  %v204_v61 = vadd.f32 %v203_v52, %v202_v51  ;;  %v212_v62 = vsel %vm174_vm0, %v151_v46, 0.0  ;;  %v220_v63 = vsel %vm174_vm0, %v152_v47, 0.0 }
  0x28   : > { %v356_v0 = vsel %vm348_vm7, %v318_v54, %v355_v55  ;;  %v181_v3 = vadd.f32 %v180_v58, %v179_v48  ;;  %v197_v4 = vadd.f32 %v196_v59, %v195_v49  ;;  %v213_v5 = vadd.f32 %v212_v62, %v211_v53 }
  0x29   : > { %377 = vmatpush.msra.mxu0 %v356_v0  ;;  %v189_v6 = vrot.slane %v188_v60, 2  ;;  %v205_v7 = vrot.slane %v204_v61, 4  ;;  %v221_v8 = vsel %vm174_vm0, %v153_v56, 0.0  ;;  %v229_v9 = vsel %vm174_vm0, %v154_v57, 0.0 }
  0x2a   : > { %v182_v11 = vrot.slane %v181_v3, 1  ;;  %v198_v12 = vrot.slane %v197_v4, 2  ;;  %v214_v13 = vrot.slane %v213_v5, 4  ;;  %v222_v14 = vadd.f32 %v221_v8, %v220_v63 }
  0x2b   : > { %v190_v15 = vadd.f32 %v189_v6, %v188_v60  ;;  %v206_v16 = vadd.f32 %v205_v7, %v204_v61  ;;  %v230_v17 = vsel %vm174_vm0, %v155_v1, 0.0  ;;  %v238_v18 = vsel %vm174_vm0, %v156_v2, 0.0  ;;  %v319_v61 = vld [vmem:[%s585_s0] sm:$0x1f] }
  0x2c   : > { %v183_v19 = vadd.f32 %v182_v11, %v181_v3  ;;  %v199_v20 = vadd.f32 %v198_v12, %v197_v4  ;;  %v215_v21 = vadd.f32 %v214_v13, %v213_v5  ;;  %v223_v22 = vrot.slane %v222_v14, 4 }
  0x2d   : > { %v191_v23 = vrot.slane %v190_v15, 1  ;;  %v207_v24 = vrot.slane %v206_v16, 2  ;;  %v231_v25 = vadd.f32 %v230_v17, %v229_v9  ;;  %v239_v26 = vsel %vm174_vm0, %v157_v10, 0.0 }
  0x2e   : > { %v200_v27 = vrot.slane %v199_v20, 1  ;;  %v216_v28 = vrot.slane %v215_v21, 2  ;;  %v224_v29 = vadd.f32 %v223_v22, %v222_v14  ;;  %v240_v30 = vadd.f32 %v239_v26, %v238_v18 }
  0x2f   : > { %v192_v31 = vadd.f32 %v191_v23, %v190_v15  ;;  %v208_v32 = vadd.f32 %v207_v24, %v206_v16  ;;  %v232_v33 = vrot.slane %v231_v25, 4 }
  0x30   : > { %v201_v34 = vadd.f32 %v200_v27, %v199_v20  ;;  %v217_v35 = vadd.f32 %v216_v28, %v215_v21  ;;  %v225_v36 = vrot.slane %v224_v29, 2  ;;  %v241_v37 = vrot.slane %v240_v30, 4 }
  0x31   : > { %v209_v38 = vrot.slane %v208_v32, 1  ;;  %v233_v39 = vadd.f32 %v232_v33, %v231_v25  ;;  %v337_v40 = vsel %vm336_vm1, %v192_v31, %v183_v19 }
  0x32   : > { %v218_v41 = vrot.slane %v217_v35, 1  ;;  %v226_v42 = vadd.f32 %v225_v36, %v224_v29  ;;  %v242_v43 = vadd.f32 %v241_v37, %v240_v30  ;;  %v339_v44 = vsel %vm338_vm2, %v201_v34, %v337_v40 }
  0x33   : > { %v210_v45 = vadd.f32 %v209_v38, %v208_v32  ;;  %v234_v46 = vrot.slane %v233_v39, 2 }
  0x34   : > { %v219_v47 = vadd.f32 %v218_v41, %v217_v35  ;;  %v227_v48 = vrot.slane %v226_v42, 1  ;;  %v243_v49 = vrot.slane %v242_v43, 2 }
  0x35   : > { %v235_v50 = vadd.f32 %v234_v46, %v233_v39  ;;  %v341_v51 = vsel %vm340_vm3, %v210_v45, %v339_v44 }
  0x36   : > { %v228_v52 = vadd.f32 %v227_v48, %v226_v42  ;;  %v244_v53 = vadd.f32 %v243_v49, %v242_v43  ;;  %v343_v54 = vsel %vm342_vm4, %v219_v47, %v341_v51 }
  0x37   : > { %v236_v55 = vrot.slane %v235_v50, 1 }
  0x38   : > { %v245_v56 = vrot.slane %v244_v53, 1  ;;  %v345_v57 = vsel %vm344_vm5, %v228_v52, %v343_v54 }
  0x39   : > { %v237_v58 = vadd.f32 %v236_v55, %v235_v50 }
  0x3a   : > { %v246_v59 = vadd.f32 %v245_v56, %v244_v53 }
  0x3b   : > { %v347_v60 = vsel %vm346_vm6, %v237_v58, %v345_v57 }
  0x3c   : > { %v349_v62 = vsel %vm348_vm7, %v246_v59, %v347_v60 }
  0x3d   : > { %378 = vmatpush.msra.mxu0 %v349_v62 }
  0x3e   : > { %446 = vmatmul.msk.f32.vlgmr.msra.gmra.mxu0 %vm359_vm8, %v319_v61 }
  0xbb   : > { %v380_v63 = vpop.f32.mrf.mxu0 }
  0xbc   : > { %384 = vst.msk [vmem:[%s141_s20] sm:$0x1f] %vm383_vm9, %v380_v63 }
  0xbd PF: > { %s12_s9 = sadd.s32 1, %s464_s9  }
  0xbe   : > { %p9_p4 = scmp.ge.s32.totalorder %s12_s9, 4  }
  0xc0   :  { %11 = sbr.rel (!%p9_p4) target bundleno = 1 (0x1), region = 58 }

</bundles_post_ra>
